<compile_context>
chip_gen: v6e
topology: v6e:2x2x1
jax: 0.10.0
libtpu: 0.0.40
codegen_flags: <defaults>
</compile_context>

<pallas_src>
import functools
import math

import jax
import jax.numpy as jnp
from jax.experimental import pallas as pl
from jax.experimental.pallas import tpu as pltpu


_LANE = 128
_MAX_TN = 32768                       # hard cap on lanes per tile
_VMEM_BUDGET = 12 * 1024 * 1024       # double-buffered working-set budget
_VMEM_LIMIT = 32 * 1024 * 1024        # explicit scoped-VMEM limit (safe on v5e/v6e/v7x)
_MIN_STEPS = 4                        # pipeline-depth / megacore-sharding target
_MIN_STEP_BYTES = 2 * 1024 * 1024     # per-step HBM traffic floor


def _round_up(v, m):
    return ((v + m - 1) // m) * m


def _make_kernel(num_k, num_p):
    def kernel(w_ref, *refs):
        # refs = (x_0, ..., x_{K-1}, out_0, ..., out_{P-1})
        xs = refs[:num_k]
        outs = refs[num_k:]
        # k-outer loop: each input tile is loaded + cast exactly once and
        # broadcast-MACed into all P accumulators (K vld, K*P VALU, P vst).
        accs = [None] * num_p
        for k in range(num_k):
            xk = xs[k][...].astype(jnp.float32)
            for p in range(num_p):
                term = xk * w_ref[p * num_k + k]
                accs[p] = term if accs[p] is None else accs[p] + term
        for p in range(num_p):
            outs[p][...] = accs[p].astype(outs[p].dtype)

    return kernel


def _choose_tn(c, num_k, num_p, r, in_itemsize, out_itemsize):
    """Lane-tile size balancing pipeline depth, per-step traffic and VMEM."""
    c128 = _round_up(c, _LANE)
    bytes_per_lane = (num_k * in_itemsize + num_p * out_itemsize) * r

    # Upper bound: double-buffered (K inputs + P outputs) blocks fit the budget.
    tn_budget = _VMEM_BUDGET // (2 * bytes_per_lane)
    tn_budget = max(_LANE, (tn_budget // _LANE) * _LANE)

    # Depth target: aim for >= _MIN_STEPS grid steps (pipelining + v7x megacore)...
    tn_depth = _round_up(pl.cdiv(c128, _MIN_STEPS), _LANE)
    # ...but never shrink a step below ~2 MiB of HBM traffic.
    tn_floor = _round_up(pl.cdiv(_MIN_STEP_BYTES, bytes_per_lane), _LANE)

    tn = min(tn_budget, _MAX_TN, max(tn_depth, tn_floor))
    tn = min(tn, c128)
    return max(tn, _LANE)


@functools.partial(jax.jit, static_argnames=("r", "c", "tn", "out_dtype_name"))
def _parallel_op_call(w_flat, xs, r, c, tn, out_dtype_name):
    num_k = len(xs)
    num_p = w_flat.shape[0] // num_k
    out_dtype = jnp.dtype(out_dtype_name)
    in_itemsize = jnp.dtype(xs[0].dtype).itemsize
    out_itemsize = out_dtype.itemsize
    grid_n = pl.cdiv(c, tn)

    # index_map receives (grid index, *scalar-prefetch refs).
    blk = pl.BlockSpec((r, tn), lambda i, w: (0, i))

    n_elems = r * c
    cost = pl.CostEstimate(
        flops=2 * num_p * num_k * n_elems,
        transcendentals=0,
        bytes_accessed=n_elems * (num_k * in_itemsize + num_p * out_itemsize),
    )

    return pl.pallas_call(
        _make_kernel(num_k, num_p),
        out_shape=tuple(
            jax.ShapeDtypeStruct((r, c), out_dtype) for _ in range(num_p)
        ),
        grid_spec=pltpu.PrefetchScalarGridSpec(
            num_scalar_prefetch=1,           # flattened (P*K,) weights -> SMEM
            grid=(grid_n,),
            in_specs=[blk] * num_k,
            out_specs=tuple([blk] * num_p),
        ),
        compiler_params=pltpu.CompilerParams(
            dimension_semantics=("parallel",),   # only matters on v7x megacore
            vmem_limit_bytes=_VMEM_LIMIT,
        ),
        cost_estimate=cost,
    )(w_flat, *xs)


def parallel_op(x_list, weights):
    """Pallas implementation of ParallelOp.forward(x, useWeights=True).

    x_list: list of num_parallel arrays, all the same shape/dtype.
    weights: (num_parallel, num_connections) float32.
    Returns a list of num_parallel arrays (same shape as inputs; dtype follows
    PyTorch type promotion of x.dtype with the f32 weights, accumulation in f32).
    """
    assert isinstance(x_list, (list, tuple)), "Input needs to be a list"
    weights = jnp.asarray(weights, jnp.float32)
    num_parallel, num_connections = weights.shape
    assert len(x_list) == num_parallel
    # zip() in the PyTorch forward truncates to min(len(x), num_connections).
    num_k = min(num_parallel, num_connections)

    xs = [jnp.asarray(x) for x in x_list[:num_k]]
    elem_shape = xs[0].shape
    x_dtype = xs[0].dtype
    for x in xs:
        assert x.shape == elem_shape and x.dtype == x_dtype

    # PyTorch promotion: bf16 inputs * f32 weights -> f32 outputs.
    out_dtype = jnp.promote_types(x_dtype, weights.dtype)

    n = math.prod(elem_shape)
    in_itemsize = jnp.dtype(x_dtype).itemsize
    out_itemsize = jnp.dtype(out_dtype).itemsize

    # Dtype-aware sublane count: 8 rows f32 / 16 bf16 / 32 int8 per packed vreg.
    r = max(8, 32 // in_itemsize)
    while r > 8 and n % r != 0:
        r //= 2
    padded = (n % r) != 0
    n_pad = _round_up(n, r) if padded else n
    c = n_pad // r

    tn = _choose_tn(c, num_k, num_parallel, r, in_itemsize, out_itemsize)

    # Effective (P, K) weight slice flattened to a 1-D f32 SMEM operand.
    w_flat = weights[:, :num_k].reshape(num_parallel * num_k)

    xs2d = []
    for x in xs:
        flat = x.reshape(-1)
        if padded:
            # Rare fallback: zero-pad so every vreg keeps full sublanes.
            flat = jnp.pad(flat, (0, n_pad - n))
        xs2d.append(flat.reshape(r, c))

    outs = _parallel_op_call(
        w_flat, tuple(xs2d), r, c, tn, jnp.dtype(out_dtype).name
    )

    if padded:
        return [o.reshape(-1)[:n].reshape(elem_shape) for o in outs]
    # Outputs are exactly n elements each: reshape back is metadata-only.
    return [o.reshape(elem_shape) for o in outs]


def _reference(x_list, weights, num_k):
    return [
        sum(x_list[k] * weights[p, k] for k in range(num_k))
        for p in range(weights.shape[0])
    ]


if __name__ == "__main__":
    key = jax.random.PRNGKey(0)
    k_w, k_x, k_x2, k_x3, k_x4 = jax.random.split(key, 5)

    num_parallel = 4
    num_connections = 4
    num_k = min(num_parallel, num_connections)

    # Deterministic parameter init mirroring: 0.001 * torch.randn((P, C))
    weights = 0.001 * jax.random.normal(
        k_w, (num_parallel, num_connections), dtype=jnp.float32
    )

    # --- Test 1: small NCHW-like f32 inputs -------------------------------
    B, C, H, W = 2, 4, 16, 16
    xs = jax.random.normal(k_x, (num_parallel, B, C, H, W), dtype=jnp.float32)
    x_list = [xs[i] for i in range(num_parallel)]
    out = [jax.block_until_ready(o) for o in parallel_op(x_list, weights)]
    ref = _reference(x_list, weights, num_k)
    for o, r_ in zip(out, ref):
        assert o.shape == (B, C, H, W) and o.dtype == jnp.float32
        assert jnp.allclose(o, r_, atol=1e-6, rtol=1e-5)

    # --- Test 2: larger f32 inputs -> multi-step grid (pipelined, v7x-shardable)
    B2, C2, H2, W2 = 4, 16, 64, 64
    xs2 = jax.random.normal(k_x2, (num_parallel, B2, C2, H2, W2), dtype=jnp.float32)
    x_list2 = [xs2[i] for i in range(num_parallel)]
    out2 = [jax.block_until_ready(o) for o in parallel_op(x_list2, weights)]
    ref2 = _reference(x_list2, weights, num_k)
    for o, r_ in zip(out2, ref2):
        assert o.shape == (B2, C2, H2, W2) and o.dtype == jnp.float32
        assert jnp.allclose(o, r_, atol=1e-6, rtol=1e-5)

    # --- Test 3: bf16 inputs -> dtype-aware sublane packing (r=16), f32 out
    xs3 = jax.random.normal(k_x3, (num_parallel, B, C, H, W), dtype=jnp.bfloat16)
    x_list3 = [xs3[i] for i in range(num_parallel)]
    out3 = [jax.block_until_ready(o) for o in parallel_op(x_list3, weights)]
    ref3 = _reference(x_list3, weights, num_k)
    for o, r_ in zip(out3, ref3):
        assert o.shape == (B, C, H, W) and o.dtype == jnp.float32
        assert jnp.allclose(o, r_, atol=1e-5, rtol=1e-3)

    # --- Test 4: element count not a multiple of 8 -> padded fallback path
    xs4 = jax.random.normal(k_x4, (num_parallel, 2, 5, 9, 3), dtype=jnp.float32)
    x_list4 = [xs4[i] for i in range(num_parallel)]
    out4 = [jax.block_until_ready(o) for o in parallel_op(x_list4, weights)]
    ref4 = _reference(x_list4, weights, num_k)
    for o, r_ in zip(out4, ref4):
        assert o.shape == (2, 5, 9, 3) and o.dtype == jnp.float32
        assert jnp.allclose(o, r_, atol=1e-6, rtol=1e-5)

    print("KERNEL_OK")
</pallas_src>

<mosaic_0001>
module attributes {stable_mosaic.version = 11 : i64} {
  func.func @kernel(%arg0: i32, %arg1: memref<16xf32, #tpu.memory_space<smem>>, %arg2: memref<8x256xf32, #tpu.memory_space<vmem>>, %arg3: memref<8x256xf32, #tpu.memory_space<vmem>>, %arg4: memref<8x256xf32, #tpu.memory_space<vmem>>, %arg5: memref<8x256xf32, #tpu.memory_space<vmem>>, %arg6: memref<8x256xf32, #tpu.memory_space<vmem>>, %arg7: memref<8x256xf32, #tpu.memory_space<vmem>>, %arg8: memref<8x256xf32, #tpu.memory_space<vmem>>, %arg9: memref<8x256xf32, #tpu.memory_space<vmem>>) attributes {dimension_semantics = [#tpu.dimension_semantics<parallel>], iteration_bounds = array<i64: 1>, scalar_prefetch = 1 : i64, scratch_operands = 0 : i64, tpu.core_type = #tpu.core_type<tc>, window_params = [{transform_indices = @transform_0, window_bounds = array<i64: 8, 256>}, {transform_indices = @transform_1, window_bounds = array<i64: 8, 256>}, {transform_indices = @transform_2, window_bounds = array<i64: 8, 256>}, {transform_indices = @transform_3, window_bounds = array<i64: 8, 256>}, {transform_indices = @transform_4, window_bounds = array<i64: 8, 256>}, {transform_indices = @transform_5, window_bounds = array<i64: 8, 256>}, {transform_indices = @transform_6, window_bounds = array<i64: 8, 256>}, {transform_indices = @transform_7, window_bounds = array<i64: 8, 256>}]} {
    %c0 = arith.constant 0 : index
    %c0_0 = arith.constant 0 : index
    %0 = vector.load %arg2[%c0, %c0_0] : memref<8x256xf32, #tpu.memory_space<vmem>>, vector<8x256xf32>
    %c0_1 = arith.constant 0 : index
    %1 = memref.load %arg1[%c0_1] : memref<16xf32, #tpu.memory_space<smem>>
    %2 = vector.broadcast %1 : f32 to vector<8x256xf32>
    %3 = arith.mulf %0, %2 : vector<8x256xf32>
    %c4 = arith.constant 4 : index
    %4 = memref.load %arg1[%c4] : memref<16xf32, #tpu.memory_space<smem>>
    %5 = vector.broadcast %4 : f32 to vector<8x256xf32>
    %6 = arith.mulf %0, %5 : vector<8x256xf32>
    %c8 = arith.constant 8 : index
    %7 = memref.load %arg1[%c8] : memref<16xf32, #tpu.memory_space<smem>>
    %8 = vector.broadcast %7 : f32 to vector<8x256xf32>
    %9 = arith.mulf %0, %8 : vector<8x256xf32>
    %c12 = arith.constant 12 : index
    %10 = memref.load %arg1[%c12] : memref<16xf32, #tpu.memory_space<smem>>
    %11 = vector.broadcast %10 : f32 to vector<8x256xf32>
    %12 = arith.mulf %0, %11 : vector<8x256xf32>
    %c0_2 = arith.constant 0 : index
    %c0_3 = arith.constant 0 : index
    %13 = vector.load %arg3[%c0_2, %c0_3] : memref<8x256xf32, #tpu.memory_space<vmem>>, vector<8x256xf32>
    %c1 = arith.constant 1 : index
    %14 = memref.load %arg1[%c1] : memref<16xf32, #tpu.memory_space<smem>>
    %15 = vector.broadcast %14 : f32 to vector<8x256xf32>
    %16 = arith.mulf %13, %15 : vector<8x256xf32>
    %17 = arith.addf %3, %16 : vector<8x256xf32>
    %c5 = arith.constant 5 : index
    %18 = memref.load %arg1[%c5] : memref<16xf32, #tpu.memory_space<smem>>
    %19 = vector.broadcast %18 : f32 to vector<8x256xf32>
    %20 = arith.mulf %13, %19 : vector<8x256xf32>
    %21 = arith.addf %6, %20 : vector<8x256xf32>
    %c9 = arith.constant 9 : index
    %22 = memref.load %arg1[%c9] : memref<16xf32, #tpu.memory_space<smem>>
    %23 = vector.broadcast %22 : f32 to vector<8x256xf32>
    %24 = arith.mulf %13, %23 : vector<8x256xf32>
    %25 = arith.addf %9, %24 : vector<8x256xf32>
    %c13 = arith.constant 13 : index
    %26 = memref.load %arg1[%c13] : memref<16xf32, #tpu.memory_space<smem>>
    %27 = vector.broadcast %26 : f32 to vector<8x256xf32>
    %28 = arith.mulf %13, %27 : vector<8x256xf32>
    %29 = arith.addf %12, %28 : vector<8x256xf32>
    %c0_4 = arith.constant 0 : index
    %c0_5 = arith.constant 0 : index
    %30 = vector.load %arg4[%c0_4, %c0_5] : memref<8x256xf32, #tpu.memory_space<vmem>>, vector<8x256xf32>
    %c2 = arith.constant 2 : index
    %31 = memref.load %arg1[%c2] : memref<16xf32, #tpu.memory_space<smem>>
    %32 = vector.broadcast %31 : f32 to vector<8x256xf32>
    %33 = arith.mulf %30, %32 : vector<8x256xf32>
    %34 = arith.addf %17, %33 : vector<8x256xf32>
    %c6 = arith.constant 6 : index
    %35 = memref.load %arg1[%c6] : memref<16xf32, #tpu.memory_space<smem>>
    %36 = vector.broadcast %35 : f32 to vector<8x256xf32>
    %37 = arith.mulf %30, %36 : vector<8x256xf32>
    %38 = arith.addf %21, %37 : vector<8x256xf32>
    %c10 = arith.constant 10 : index
    %39 = memref.load %arg1[%c10] : memref<16xf32, #tpu.memory_space<smem>>
    %40 = vector.broadcast %39 : f32 to vector<8x256xf32>
    %41 = arith.mulf %30, %40 : vector<8x256xf32>
    %42 = arith.addf %25, %41 : vector<8x256xf32>
    %c14 = arith.constant 14 : index
    %43 = memref.load %arg1[%c14] : memref<16xf32, #tpu.memory_space<smem>>
    %44 = vector.broadcast %43 : f32 to vector<8x256xf32>
    %45 = arith.mulf %30, %44 : vector<8x256xf32>
    %46 = arith.addf %29, %45 : vector<8x256xf32>
    %c0_6 = arith.constant 0 : index
    %c0_7 = arith.constant 0 : index
    %47 = vector.load %arg5[%c0_6, %c0_7] : memref<8x256xf32, #tpu.memory_space<vmem>>, vector<8x256xf32>
    %c3 = arith.constant 3 : index
    %48 = memref.load %arg1[%c3] : memref<16xf32, #tpu.memory_space<smem>>
    %49 = vector.broadcast %48 : f32 to vector<8x256xf32>
    %50 = arith.mulf %47, %49 : vector<8x256xf32>
    %51 = arith.addf %34, %50 : vector<8x256xf32>
    %c7 = arith.constant 7 : index
    %52 = memref.load %arg1[%c7] : memref<16xf32, #tpu.memory_space<smem>>
    %53 = vector.broadcast %52 : f32 to vector<8x256xf32>
    %54 = arith.mulf %47, %53 : vector<8x256xf32>
    %55 = arith.addf %38, %54 : vector<8x256xf32>
    %c11 = arith.constant 11 : index
    %56 = memref.load %arg1[%c11] : memref<16xf32, #tpu.memory_space<smem>>
    %57 = vector.broadcast %56 : f32 to vector<8x256xf32>
    %58 = arith.mulf %47, %57 : vector<8x256xf32>
    %59 = arith.addf %42, %58 : vector<8x256xf32>
    %c15 = arith.constant 15 : index
    %60 = memref.load %arg1[%c15] : memref<16xf32, #tpu.memory_space<smem>>
    %61 = vector.broadcast %60 : f32 to vector<8x256xf32>
    %62 = arith.mulf %47, %61 : vector<8x256xf32>
    %63 = arith.addf %46, %62 : vector<8x256xf32>
    %c0_8 = arith.constant 0 : index
    %c0_9 = arith.constant 0 : index
    %64 = vector.load %arg6[%c0_8, %c0_9] : memref<8x256xf32, #tpu.memory_space<vmem>>, vector<8x256xf32>
    tpu.vector_store %arg6[%c0_8, %c0_9], %51 {strides = array<i32>} : memref<8x256xf32, #tpu.memory_space<vmem>>, vector<8x256xf32>,
    %c0_10 = arith.constant 0 : index
    %c0_11 = arith.constant 0 : index
    %65 = vector.load %arg7[%c0_10, %c0_11] : memref<8x256xf32, #tpu.memory_space<vmem>>, vector<8x256xf32>
    tpu.vector_store %arg7[%c0_10, %c0_11], %55 {strides = array<i32>} : memref<8x256xf32, #tpu.memory_space<vmem>>, vector<8x256xf32>,
    %c0_12 = arith.constant 0 : index
    %c0_13 = arith.constant 0 : index
    %66 = vector.load %arg8[%c0_12, %c0_13] : memref<8x256xf32, #tpu.memory_space<vmem>>, vector<8x256xf32>
    tpu.vector_store %arg8[%c0_12, %c0_13], %59 {strides = array<i32>} : memref<8x256xf32, #tpu.memory_space<vmem>>, vector<8x256xf32>,
    %c0_14 = arith.constant 0 : index
    %c0_15 = arith.constant 0 : index
    %67 = vector.load %arg9[%c0_14, %c0_15] : memref<8x256xf32, #tpu.memory_space<vmem>>, vector<8x256xf32>
    tpu.vector_store %arg9[%c0_14, %c0_15], %63 {strides = array<i32>} : memref<8x256xf32, #tpu.memory_space<vmem>>, vector<8x256xf32>,
    return
  }
  func.func @transform_0(%arg0: i32, %arg1: memref<16xf32, #tpu.memory_space<smem>>) -> (i32, i32) {
    %c0_i32 = arith.constant 0 : i32
    %c0_i32_0 = arith.constant 0 : i32
    return %c0_i32, %arg0 : i32, i32
  }
  func.func @transform_1(%arg0: i32, %arg1: memref<16xf32, #tpu.memory_space<smem>>) -> (i32, i32) {
    %c0_i32 = arith.constant 0 : i32
    %c0_i32_0 = arith.constant 0 : i32
    return %c0_i32, %arg0 : i32, i32
  }
  func.func @transform_2(%arg0: i32, %arg1: memref<16xf32, #tpu.memory_space<smem>>) -> (i32, i32) {
    %c0_i32 = arith.constant 0 : i32
    %c0_i32_0 = arith.constant 0 : i32
    return %c0_i32, %arg0 : i32, i32
  }
  func.func @transform_3(%arg0: i32, %arg1: memref<16xf32, #tpu.memory_space<smem>>) -> (i32, i32) {
    %c0_i32 = arith.constant 0 : i32
    %c0_i32_0 = arith.constant 0 : i32
    return %c0_i32, %arg0 : i32, i32
  }
  func.func @transform_4(%arg0: i32, %arg1: memref<16xf32, #tpu.memory_space<smem>>) -> (i32, i32) {
    %c0_i32 = arith.constant 0 : i32
    %c0_i32_0 = arith.constant 0 : i32
    return %c0_i32, %arg0 : i32, i32
  }
  func.func @transform_5(%arg0: i32, %arg1: memref<16xf32, #tpu.memory_space<smem>>) -> (i32, i32) {
    %c0_i32 = arith.constant 0 : i32
    %c0_i32_0 = arith.constant 0 : i32
    return %c0_i32, %arg0 : i32, i32
  }
  func.func @transform_6(%arg0: i32, %arg1: memref<16xf32, #tpu.memory_space<smem>>) -> (i32, i32) {
    %c0_i32 = arith.constant 0 : i32
    %c0_i32_0 = arith.constant 0 : i32
    return %c0_i32, %arg0 : i32, i32
  }
  func.func @transform_7(%arg0: i32, %arg1: memref<16xf32, #tpu.memory_space<smem>>) -> (i32, i32) {
    %c0_i32 = arith.constant 0 : i32
    %c0_i32_0 = arith.constant 0 : i32
    return %c0_i32, %arg0 : i32, i32
  }
}

</mosaic_0001>

<bundles_post_ra>
// kernel: _parallel_op_call.1
= control target key start
LH: loop header
LB: loop body
LE: loop exit
PB: predicated region body
PF: predicated region fallthrough
CT: control target
= control target key end

     0   :  { %s444_s27 = smov [#allocation3]   ;;  %s609_s0 = inlined_call_operand.hbm [shape: f32[16], index: 0, kind: input, shape index: {}]   ;;  %s610_s1 = inlined_call_operand.hbm [shape: f32[8,256], index: 1, kind: input, shape index: {}]   ;;  %s611_s2 = inlined_call_operand.hbm [shape: f32[8,256], index: 2, kind: input, shape index: {}]   ;;  %s612_s3 = inlined_call_operand.hbm [shape: f32[8,256], index: 3, kind: input, shape index: {}]   ;;  %s613_s4 = inlined_call_operand.hbm [shape: f32[8,256], index: 4, kind: input, shape index: {}]   ;;  %s614_s5 = inlined_call_operand.hbm [shape: f32[8,256], index: 5, kind: output, shape index: {0}]   ;;  %s615_s6 = inlined_call_operand.hbm [shape: f32[8,256], index: 6, kind: output, shape index: {1}]   ;;  %s616_s7 = inlined_call_operand.hbm [shape: f32[8,256], index: 7, kind: output, shape index: {2}]   ;;  %s617_s8 = inlined_call_operand.hbm [shape: f32[8,256], index: 8, kind: output, shape index: {3}]  }
   0x1   :  { %15 = dma.hbm_to_smem %s609_s0, 16, %s444_s27, [#allocation2] }
   0x2   :  { %430 = dma.done.wait [#allocation2], 16 }
   0x3   :  { %431 = vsyncadd [#allocation2], 4294967280 }
   0x4   :  { %17 = sfence }
   0x5   :  { %18 = vsyncpa [#allocation5], 0 }
   0x6   :  { %19 = vsyncpa [#allocation8], 0 }
   0x7   :  { %20 = vsyncpa [#allocation11], 0 }
   0x8   :  { %21 = vsyncpa [#allocation6], 0 }
   0x9   :  { %22 = vsyncpa [#allocation14], 0 }
   0xa   :  { %23 = vsyncpa [#allocation17], 0  ;;  %s445_s30 = smov [#allocation7]   ;;  %s446_s10 = smov [#allocation4]  }
   0xb   :  { %s40_s9 = sshll.u32 %s445_s30, 4  ;;  %s30_s11 = sshll.u32 %s446_s10, 4  ;;  %s41_s9 = int_to_ptr.vmem [resolvable:$true] %s40_s9  ;;  %s31_s11 = int_to_ptr.vmem [resolvable:$true] %s30_s11 }
   0xc   :  { %s278_s12 = scalar_lea.vmem %s41_s9, 256  ;;  %p283_p1 = scmp.lt.s32.totalorder %s41_s9, %s41_s9 }
   0xd   :  { %p279_p0 = scmp.ne.s32.totalorder %s41_s9, %s278_s12  ;;  %p284_p2 = scmp.lt.s32.totalorder %s278_s12, %s278_s12 }
   0xf   :  { %p285_p3 = por %p284_p2, %p283_p1 }
  0x11   :  { %p286_p4 = pnand %p285_p3, %p279_p0 }
  0x13   :  { %289 = shalt.err (!%p286_p4)
}
  0x14   :  { %43 = dma.hbm_to_vmem [thread:$0]  %s611_s2, 256, %s41_s9, [#allocation8]  }
  0x15   :  { %s298_s14 = scalar_lea.vmem %s31_s11, 256  ;;  %p303_p6 = scmp.lt.s32.totalorder %s31_s11, %s31_s11 }
  0x16   :  { %p299_p5 = scmp.ne.s32.totalorder %s31_s11, %s298_s14  ;;  %p304_p7 = scmp.lt.s32.totalorder %s298_s14, %s298_s14 }
  0x18   :  { %p305_p8 = por %p304_p7, %p303_p6 }
  0x1a   :  { %p306_p9 = pnand %p305_p8, %p299_p5 }
  0x1c   :  { %309 = shalt.err (!%p306_p9)
}
  0x1d   :  { %33 = dma.hbm_to_vmem [thread:$0]  %s610_s1, 256, %s31_s11, [#allocation5]  }
  0x1e   :  { %s447_s17 = smov [#allocation9]   ;;  %s448_s19 = smov [#allocation10]  }
  0x1f   :  { %s50_s18 = sshll.u32 %s447_s17, 4  ;;  %s60_s20 = sshll.u32 %s448_s19, 4  ;;  %s51_s18 = int_to_ptr.vmem [resolvable:$true] %s50_s18  ;;  %s61_s20 = int_to_ptr.vmem [resolvable:$true] %s60_s20 }
  0x20   :  { %s318_s21 = scalar_lea.vmem %s51_s18, 256  ;;  %p323_p11 = scmp.lt.s32.totalorder %s51_s18, %s51_s18 }
  0x21   :  { %p319_p10 = scmp.ne.s32.totalorder %s51_s18, %s318_s21  ;;  %p324_p12 = scmp.lt.s32.totalorder %s318_s21, %s318_s21 }
  0x23   :  { %p325_p13 = por %p324_p12, %p323_p11 }
  0x25   :  { %p326_p0 = pnand %p325_p13, %p319_p10 }
  0x27   :  { %329 = shalt.err (!%p326_p0)
}
  0x28   :  { %53 = dma.hbm_to_vmem [thread:$0]  %s612_s3, 256, %s51_s18, [#allocation8]  }
  0x29   :  { %s338_s23 = scalar_lea.vmem %s61_s20, 256  ;;  %p343_p2 = scmp.lt.s32.totalorder %s61_s20, %s61_s20 }
  0x2a   :  { %p339_p1 = scmp.ne.s32.totalorder %s61_s20, %s338_s23  ;;  %p344_p3 = scmp.lt.s32.totalorder %s338_s23, %s338_s23 }
  0x2c   :  { %p345_p4 = por %p344_p3, %p343_p2 }
  0x2e   :  { %p346_p5 = pnand %p345_p4, %p339_p1 }
  0x30   :  { %349 = shalt.err (!%p346_p5)
}
  0x31   :  { %63 = dma.hbm_to_vmem [thread:$0]  %s613_s4, 256, %s61_s20, [#allocation11]  }
  0x32   :  { %432 = dma.done.wait [#allocation5], 256  }
  0x33   :  { %433 = vsyncadd [#allocation5], 4294967040 }
  0x34   :  { %434 = dma.done.wait [#allocation8], 512  }
  0x35   :  { %435 = vsyncadd [#allocation8], 4294966784 }
  0x36   :  { %436 = dma.done.wait [#allocation11], 256  }
  0x37   :  { %437 = vsyncadd [#allocation11], 4294967040  ;;  %s238_s25 = sld [smem:[#allocation3 + $0x4]]  ;;  %v517_v0 = vld [vmem:[#allocation4] sm:$0xff]  ;;  %v519_v2 = vld [vmem:[#allocation7] sm:$0xff]  ;;  %s449_s0 = smov [#allocation13]  }
  0x38   :  { %s242_s26 = sld [smem:[#allocation3 + $0x5]]  ;;  %v521_v3 = vld [vmem:[#allocation9] sm:$0xff]  ;;  %v526_v6 = vld [vmem:[#allocation10] sm:$0xff]  ;;  %v528_v7 = vld [vmem:[#allocation4 + $0x8] sm:$0xff]  ;;  %s196_s13 = sshll.u32 %s449_s0, 4  ;;  %s197_s13 = int_to_ptr.vmem [resolvable:$true] %s196_s13 }
  0x39   :  { %s246_s3 = sld [smem:[#allocation3 + $0x6]]  ;;  %v530_v8 = vld [vmem:[#allocation7 + $0x8] sm:$0xff]  ;;  %v537_v13 = vld [vmem:[#allocation9 + $0x8] sm:$0xff]  ;;  %s450_s18 = smov [#allocation12]  }
  0x3a   :  { %s250_s27 = sld [smem:[#allocation3 + $0x7]]  ;;  %v539_v14 = vld [vmem:[#allocation10 + $0x8] sm:$0xff]  ;;  %s186_s19 = sshll.u32 %s450_s18, 4  ;;  %s187_s19 = int_to_ptr.vmem [resolvable:$true] %s186_s19 }
  0x3b   :  { %s513_s28 = sld [smem:[#allocation3]]  ;;  %s350_s20 = scalar_lea.vmem %s197_s13, 256 }
  0x3c   :  { %s515_s29 = sld [smem:[#allocation3 + $0x1]]  ;;  %p351_p6 = scmp.ne.s32.totalorder %s197_s13, %s350_s20 }
  0x3d   :  { %v83_v1 = vstv %s238_s25  ;;  %s523_s4 = sld [smem:[#allocation3 + $0x2]]  ;;  %p355_p7 = scmp.lt.s32.totalorder %s197_s13, %s197_s13 }
  0x3e   :  { %v84_v4 = vmul.f32 %v83_v1, %v517_v0  ;;  %v103_v5 = vstv %s242_s26  ;;  %s532_s30 = sld [smem:[#allocation3 + $0x3]]  ;;  %v85_v11 = vmul.f32 %v83_v1, %v528_v7  ;;  %p356_p8 = scmp.lt.s32.totalorder %s350_s20, %s350_s20 }
  0x3f   :  { %v104_v9 = vmul.f32 %v103_v5, %v519_v2  ;;  %v129_v10 = vstv %s246_s3  ;;  %v105_v12 = vmul.f32 %v103_v5, %v530_v8  ;;  %s541_s9 = sld [smem:[#allocation3 + $0x8]] }
  0x40   :  { %v130_v15 = vmul.f32 %v129_v10, %v521_v3  ;;  %v155_v16 = vstv %s250_s27  ;;  %v131_v17 = vmul.f32 %v129_v10, %v537_v13  ;;  %s545_s10 = sld [smem:[#allocation3 + $0x9]]  ;;  %p357_p9 = por %p356_p8, %p355_p7 }
  0x41   :  { %v106_v18 = vadd.f32 %v104_v9, %v84_v4  ;;  %v156_v19 = vmul.f32 %v155_v16, %v526_v6  ;;  %v107_v20 = vadd.f32 %v105_v12, %v85_v11  ;;  %v157_v21 = vmul.f32 %v155_v16, %v539_v14  ;;  %s549_s11 = sld [smem:[#allocation3 + $0xa]] }
  0x42   :  { %v79_v22 = vstv %s513_s28  ;;  %v97_v23 = vstv %s515_s29  ;;  %s553_s12 = sld [smem:[#allocation3 + $0xb]]  ;;  %p358_p10 = pnand %p357_p9, %p351_p6 }
  0x43   :  { %v132_v24 = vadd.f32 %v130_v15, %v106_v18  ;;  %v133_v25 = vadd.f32 %v131_v17, %v107_v20  ;;  %v80_v26 = vmul.f32 %v79_v22, %v517_v0  ;;  %v98_v27 = vmul.f32 %v97_v23, %v519_v2  ;;  %s557_s14 = sld [smem:[#allocation3 + $0xc]] }
  0x44   :  { %v123_v28 = vstv %s523_s4  ;;  %v149_v29 = vstv %s532_s30  ;;  %v81_v30 = vmul.f32 %v79_v22, %v528_v7  ;;  %v99_v31 = vmul.f32 %v97_v23, %v530_v8  ;;  %s563_s15 = sld [smem:[#allocation3 + $0xd]] }
  0x45   :  { %v158_v32 = vadd.f32 %v156_v19, %v132_v24  ;;  %v159_v33 = vadd.f32 %v157_v21, %v133_v25  ;;  %v100_v34 = vadd.f32 %v98_v27, %v80_v26  ;;  %v124_v35 = vmul.f32 %v123_v28, %v521_v3  ;;  %s566_s16 = sld [smem:[#allocation3 + $0xe]] }
  0x46   :  { %v150_v36 = vmul.f32 %v149_v29, %v526_v6  ;;  %v101_v37 = vadd.f32 %v99_v31, %v81_v30  ;;  %v125_v38 = vmul.f32 %v123_v28, %v537_v13  ;;  %v151_v39 = vmul.f32 %v149_v29, %v539_v14  ;;  %s571_s17 = sld [smem:[#allocation3 + $0xf]] }
  0x47   :  { %174 = vst [vmem:[#allocation13] sm:$0xff] %v158_v32  ;;  %175 = vst [vmem:[#allocation13 + $0x8] sm:$0xff] %v159_v33  ;;  %v126_v40 = vadd.f32 %v124_v35, %v100_v34  ;;  %v87_v41 = vstv %s541_s9  ;;  %v109_v42 = vstv %s545_s10  ;;  %v135_v43 = vstv %s549_s11 }
  0x48   :  { %v127_v44 = vadd.f32 %v125_v38, %v101_v37  ;;  %v88_v45 = vmul.f32 %v87_v41, %v517_v0  ;;  %v110_v46 = vmul.f32 %v109_v42, %v519_v2  ;;  %v136_v47 = vmul.f32 %v135_v43, %v521_v3 }
  0x49   :  { %361 = shalt.err (!%p358_p10)
}
  0x4a   :  { %199 = dma.vmem_to_hbm [thread:$0]  %s197_s13, 256, %s615_s6, [#allocation14]   ;;  %v152_v48 = vadd.f32 %v150_v36, %v126_v40  ;;  %v161_v49 = vstv %s553_s12  ;;  %v89_v50 = vmul.f32 %v87_v41, %v528_v7  ;;  %v111_v51 = vmul.f32 %v109_v42, %v530_v8 }
  0x4b   :  { %v153_v52 = vadd.f32 %v151_v39, %v127_v44  ;;  %v112_v53 = vadd.f32 %v110_v46, %v88_v45  ;;  %v162_v54 = vmul.f32 %v161_v49, %v526_v6  ;;  %v137_v55 = vmul.f32 %v135_v43, %v537_v13  ;;  %s451_s6 = smov [#allocation15]   ;;  %s370_s23 = scalar_lea.vmem %s187_s19, 256 }
  0x4c   :  { %172 = vst [vmem:[#allocation12] sm:$0xff] %v152_v48  ;;  %v113_v56 = vadd.f32 %v111_v51, %v89_v50  ;;  %v163_v57 = vmul.f32 %v161_v49, %v539_v14  ;;  %v91_v58 = vstv %s557_s14  ;;  %v115_v59 = vstv %s563_s15  ;;  %s206_s22 = sshll.u32 %s451_s6, 4  ;;  %p371_p11 = scmp.ne.s32.totalorder %s187_s19, %s370_s23  ;;  %s207_s22 = int_to_ptr.vmem [resolvable:$true] %s206_s22 }
  0x4d   :  { %173 = vst [vmem:[#allocation12 + $0x8] sm:$0xff] %v153_v52  ;;  %v138_v60 = vadd.f32 %v136_v47, %v112_v53  ;;  %v92_v61 = vmul.f32 %v91_v58, %v517_v0  ;;  %v116_v62 = vmul.f32 %v115_v59, %v519_v2  ;;  %v141_v63 = vstv %s566_s16  ;;  %p375_p12 = scmp.lt.s32.totalorder %s187_s19, %s187_s19  ;;  %p376_p13 = scmp.lt.s32.totalorder %s370_s23, %s370_s23 }
  0x4e   :  { %v139_v1 = vadd.f32 %v137_v55, %v113_v56  ;;  %v142_v4 = vmul.f32 %v141_v63, %v521_v3  ;;  %v167_v5 = vstv %s571_s17  ;;  %v93_v9 = vmul.f32 %v91_v58, %v528_v7 }
  0x4f   :  { %p377_p0 = por %p376_p13, %p375_p12 }
  0x51   :  { %p378_p1 = pnand %p377_p0, %p371_p11 }
  0x53   :  { %381 = shalt.err (!%p378_p1)
}
  0x54   :  { %189 = dma.vmem_to_hbm [thread:$0]  %s187_s19, 256, %s614_s5, [#allocation6]   ;;  %v164_v0 = vadd.f32 %v162_v54, %v138_v60  ;;  %v118_v2 = vadd.f32 %v116_v62, %v92_v61  ;;  %v168_v10 = vmul.f32 %v167_v5, %v526_v6  ;;  %v117_v3 = vmul.f32 %v115_v59, %v530_v8 }
  0x55   :  { %v165_v11 = vadd.f32 %v163_v57, %v139_v1  ;;  %v143_v7 = vmul.f32 %v141_v63, %v537_v13  ;;  %v169_v16 = vmul.f32 %v167_v5, %v539_v14  ;;  %s452_s25 = smov [#allocation16]   ;;  %s390_s5 = scalar_lea.vmem %s207_s22, 256 }
  0x56   :  { %176 = vst [vmem:[#allocation15] sm:$0xff] %v164_v0  ;;  %v144_v12 = vadd.f32 %v142_v4, %v118_v2  ;;  %v119_v15 = vadd.f32 %v117_v3, %v93_v9  ;;  %s216_s26 = sshll.u32 %s452_s25, 4  ;;  %p391_p2 = scmp.ne.s32.totalorder %s207_s22, %s390_s5  ;;  %s217_s26 = int_to_ptr.vmem [resolvable:$true] %s216_s26 }
  0x57   :  { %177 = vst [vmem:[#allocation15 + $0x8] sm:$0xff] %v165_v11  ;;  %p395_p3 = scmp.lt.s32.totalorder %s207_s22, %s207_s22  ;;  %p396_p4 = scmp.lt.s32.totalorder %s390_s5, %s390_s5 }
  0x58   :  { %v170_v17 = vadd.f32 %v168_v10, %v144_v12  ;;  %v145_v18 = vadd.f32 %v143_v7, %v119_v15 }
  0x59   :  { %p397_p5 = por %p396_p4, %p395_p3 }
  0x5b   :  { %p398_p6 = pnand %p397_p5, %p391_p2 }
  0x5d   :  { %401 = shalt.err (!%p398_p6)
}
  0x5e   :  { %209 = dma.vmem_to_hbm [thread:$0]  %s207_s22, 256, %s616_s7, [#allocation14]   ;;  %178 = vst [vmem:[#allocation16] sm:$0xff] %v170_v17  ;;  %v171_v6 = vadd.f32 %v169_v16, %v145_v18 }
  0x5f   :  { %s410_s28 = scalar_lea.vmem %s217_s26, 256  ;;  %p415_p8 = scmp.lt.s32.totalorder %s217_s26, %s217_s26 }
  0x60   :  { %179 = vst [vmem:[#allocation16 + $0x8] sm:$0xff] %v171_v6  ;;  %p411_p7 = scmp.ne.s32.totalorder %s217_s26, %s410_s28  ;;  %p416_p9 = scmp.lt.s32.totalorder %s410_s28, %s410_s28 }
  0x62   :  { %p417_p10 = por %p416_p9, %p415_p8 }
  0x64   :  { %p418_p11 = pnand %p417_p10, %p411_p7 }
  0x66   :  { %421 = shalt.err (!%p418_p11)
}
  0x67   :  { %219 = dma.vmem_to_hbm [thread:$0]  %s217_s26, 256, %s617_s8, [#allocation17]  }
  0x68   :  { %438 = dma.done.wait [#allocation6], 256  }
  0x69   :  { %439 = vsyncadd [#allocation6], 4294967040 }
  0x6a   :  { %440 = dma.done.wait [#allocation14], 512  }
  0x6b   :  { %441 = vsyncadd [#allocation14], 4294966784 }
  0x6c   :  { %442 = dma.done.wait [#allocation17], 256  }
  0x6d   :  { %443 = vsyncadd [#allocation17], 4294967040 }
  0x6e   :  { %232 = vsyncpa [#allocation5], 1 }
  0x6f   :  { %233 = vsyncpa [#allocation8], 1 }
  0x70   :  { %234 = vsyncpa [#allocation11], 1 }
  0x71   :  { %235 = vsyncpa [#allocation6], 1 }
  0x72   :  { %236 = vsyncpa [#allocation14], 1 }
  0x73   :  { %237 = vsyncpa [#allocation17], 1 }

</bundles_post_ra>
